<compile_context>
chip_gen: v7x
topology: tpu7x:2x2x1
jax: 0.10.0
libtpu: 0.0.40
codegen_flags: <defaults>
</compile_context>

<pallas_src>
import functools

import jax
import jax.numpy as jnp
from jax import lax
from jax.experimental import pallas as pl
from jax.experimental.pallas import tpu as pltpu

_LANES = 128
_SPLIT = 2  # leading parallel grid axis: shards HW tiles across v7x's 2 TCs


def _round_up(x, m):
    return ((x + m - 1) // m) * m


def _tree_sum_lanes(x):
    """(C, k*128) -> (C, 128) via a balanced tree of lane-aligned adds."""
    k = x.shape[-1] // _LANES
    parts = [x[:, i * _LANES:(i + 1) * _LANES] for i in range(k)]
    while len(parts) > 1:
        nxt = [parts[i] + parts[i + 1] for i in range(0, len(parts) - 1, 2)]
        if len(parts) % 2:
            nxt.append(parts[-1])
        parts = nxt
    return parts[0]


def _soft_iou_kernel(x_ref, t_ref, inter_ref, psum_ref, *,
                     hw_total, num_tiles, tiles_per_split, chunk, unroll):
    # x_ref:     (1, C, T)       logits tile (incoming dtype)
    # t_ref:     (1, 1, T)       integer class labels
    # inter_ref: (1, 1, C, 128)  f32 running partials of sum(pred * onehot)
    # psum_ref:  (1, 1, C, 128)  f32 running partials of sum(pred)
    split = pl.program_id(0)
    j = pl.program_id(2)
    _, C, T = x_ref.shape
    n_chunks = T // chunk

    @pl.when(j == 0)
    def _init():
        inter_ref[...] = jnp.zeros_like(inter_ref)
        psum_ref[...] = jnp.zeros_like(psum_ref)

    # Logical (unclamped) tile index; >= num_tiles means a fully-masked
    # duplicate tile (the input index_map clamps the DMA to stay in-bounds).
    tidx = split * tiles_per_split + j

    # hoisted constants (not re-materialized per unrolled chunk)
    cls = lax.broadcasted_iota(jnp.int32, (C, 1), 0)        # (C, 1)
    lane = lax.broadcasted_iota(jnp.int32, (1, chunk), 1)   # (1, chunk)

    def run(apply_mask):
        def body(ci, carry):
            acc_i, acc_p = carry
            off = pl.multiple_of(ci * chunk, chunk)
            x = x_ref[0, :, pl.ds(off, chunk)].astype(jnp.float32)   # (C, chunk)
            t = t_ref[0, :, pl.ds(off, chunk)].astype(jnp.int32)     # (1, chunk)

            # numerically-stable softmax over the channel (sublane) axis
            m = jnp.max(x, axis=0, keepdims=True)
            e = jnp.exp(x - m)
            inv = pl.reciprocal(jnp.sum(e, axis=0, keepdims=True), approx=False)
            pred = e * inv                                           # (C, chunk)

            is_cls = t == cls                                        # (C, chunk)
            inter_e = jnp.where(is_cls, pred, 0.0)
            psum_e = pred
            if apply_mask:
                # selects (not multiplies) so garbage/NaN in OOB lanes is dropped
                valid = (tidx * T + off + lane) < hw_total           # (1, chunk)
                inter_e = jnp.where(valid, inter_e, 0.0)
                psum_e = jnp.where(valid, psum_e, 0.0)

            return (acc_i + _tree_sum_lanes(inter_e),
                    acc_p + _tree_sum_lanes(psum_e))

        zeros = jnp.zeros((C, _LANES), jnp.float32)
        acc_i, acc_p = lax.fori_loop(0, n_chunks, body, (zeros, zeros),
                                     unroll=unroll)
        inter_ref[...] += acc_i[None, None]
        psum_ref[...] += acc_p[None, None]

    # Only the last real tile (and duplicate tiles) can hold out-of-range lanes.
    needs_mask = tidx >= num_tiles - 1

    @pl.when(needs_mask)
    def _masked():
        run(True)

    @pl.when(jnp.logical_not(needs_mask))
    def _fast():
        run(False)


@functools.partial(jax.jit, static_argnames=("n_classes", "tile_hw"))
def soft_iou_loss(logits, target, n_classes, *, tile_hw=None):
    """Soft-IoU loss: -mean_{n,c}[ inter / (union + 1e-16) ].

    logits: (N, C, H, W) float; target: (N, H, W) integer class indices.
    """
    N, C, H, W = logits.shape
    assert C == n_classes
    hw = H * W

    x = logits.reshape(N, C, hw)                      # keep incoming dtype (bf16 ok)
    if not jnp.issubdtype(target.dtype, jnp.integer):
        target = target.astype(jnp.int32)
    t = target.reshape(N, 1, hw)                      # no forced int32 upcast

    x_bytes = jnp.dtype(logits.dtype).itemsize

    # inner-loop chunk: <=1024 lanes, shrunk for very large C to cap live vregs
    hw128 = _round_up(hw, _LANES)
    chunk = _LANES
    while chunk < min(1024, hw128) and C * (2 * chunk) * 4 <= 256 * 1024:
        chunk *= 2

    # spatial tile: ~2 MiB of logits per grid step (clamped), multiple of chunk
    if tile_hw is None:
        target_lanes = max((2 * 1024 * 1024) // (x_bytes * C), 1)
        target_lanes = max(chunk, min(pl.next_power_of_2(target_lanes), 65536))
    else:
        target_lanes = max(chunk, tile_hw)
    tile = min(_round_up(hw, chunk), _round_up(target_lanes, chunk))

    num_tiles = pl.cdiv(hw, tile)
    tiles_per_split = pl.cdiv(num_tiles, _SPLIT)
    n_chunks = tile // chunk
    unroll = min(n_chunks, 4)

    kernel = functools.partial(
        _soft_iou_kernel, hw_total=hw, num_tiles=num_tiles,
        tiles_per_split=tiles_per_split, chunk=chunk, unroll=unroll)

    def in_map(s, n, j):
        # Clamp so duplicate tiles (odd num_tiles / num_tiles < _SPLIT) DMA
        # in-bounds data; their contribution is zeroed by the in-kernel mask.
        return (n, 0, jnp.minimum(s * tiles_per_split + j, num_tiles - 1))

    out_map = lambda s, n, j: (s, n, 0, 0)

    # explicit VMEM budget (double-buffered inputs + resident accumulators +
    # chunk temporaries + slack); comfortably below v7x's 64 MiB physical.
    est_vmem = (2 * 2 * tile * (C * x_bytes + t.dtype.itemsize)
                + 4 * _SPLIT * C * _LANES * 4
                + 16 * C * chunk * 4
                + (4 << 20))
    vmem_limit = int(min(max(est_vmem, 32 << 20), 48 << 20))

    inter_p, psum_p = pl.pallas_call(
        kernel,
        out_shape=(
            jax.ShapeDtypeStruct((_SPLIT, N, C, _LANES), jnp.float32),
            jax.ShapeDtypeStruct((_SPLIT, N, C, _LANES), jnp.float32),
        ),
        grid_spec=pltpu.PrefetchScalarGridSpec(
            num_scalar_prefetch=0,
            grid=(_SPLIT, N, tiles_per_split),
            in_specs=[
                pl.BlockSpec((1, C, tile), in_map),
                pl.BlockSpec((1, 1, tile), in_map),
            ],
            out_specs=(
                pl.BlockSpec((1, 1, C, _LANES), out_map),
                pl.BlockSpec((1, 1, C, _LANES), out_map),
            ),
        ),
        compiler_params=pltpu.CompilerParams(
            dimension_semantics=("parallel", "parallel", "arbitrary"),
            vmem_limit_bytes=vmem_limit),
    )(x, t)

    # tiny epilogue: fold split/lane partials, rebuild union from class counts
    inter = inter_p.sum(axis=(0, 3))                  # (N, C)
    psum = psum_p.sum(axis=(0, 3))                    # (N, C)
    counts = jax.vmap(lambda v: jnp.bincount(v, length=C))(
        target.reshape(N, hw)).astype(jnp.float32)    # per-class pixel counts
    union = psum + counts - inter                     # == sum(pred + onehot - pred*onehot)
    return -jnp.mean(inter / (union + 1e-16))


if __name__ == "__main__":
    key = jax.random.PRNGKey(0)
    k1, k2 = jax.random.split(key)

    N, C, H, W = 2, 4, 16, 16
    logits = jax.random.normal(k1, (N, C, H, W), dtype=jnp.float32)
    target = jax.random.randint(k2, (N, H, W), 0, C, dtype=jnp.int32)

    loss = soft_iou_loss(logits, target, n_classes=C)
    jax.block_until_ready(loss)

    # pure-JAX reference check
    pred = jax.nn.softmax(logits, axis=1)
    onehot = jax.nn.one_hot(target, C, axis=1, dtype=jnp.float32)
    inter = (pred * onehot).reshape(N, C, -1).sum(2)
    union = (pred + onehot - pred * onehot).reshape(N, C, -1).sum(2)
    ref = -(inter / (union + 1e-16)).mean()
    assert jnp.allclose(loss, ref, rtol=1e-5, atol=1e-6), (loss, ref)

    print("KERNEL_OK")
</pallas_src>

<mosaic_0001>
module attributes {stable_mosaic.version = 11 : i64} {
  func.func private @main(%arg0: i32) attributes {dimension_semantics = [#tpu.dimension_semantics<core_parallel>], iteration_bounds = array<i64: 2>, tpu.core_type = #tpu.core_type<sc_scalar_subcore>, window_params = []} {
    return
  }
}

module attributes {stable_mosaic.version = 11 : i64} {
  func.func private @main(%arg0: i32) attributes {dimension_semantics = [#tpu.dimension_semantics<core_parallel>], iteration_bounds = array<i64: 2>, tpu.core_type = #tpu.core_type<sc_scalar_subcore>, window_params = []} {
    return
  }
}

module attributes {stable_mosaic.version = 11 : i64} {
  func.func @_soft_iou_kernel(%arg0: i32, %arg1: i32, %arg2: i32, %arg3: memref<1x4x256xf32, #tpu.memory_space<vmem>>, %arg4: memref<1x1x256xi32, #tpu.memory_space<vmem>>, %arg5: memref<1x1x4x128xf32, #tpu.memory_space<vmem>>, %arg6: memref<1x1x4x128xf32, #tpu.memory_space<vmem>>) attributes {dimension_semantics = [#tpu.dimension_semantics<parallel>, #tpu.dimension_semantics<parallel>, #tpu.dimension_semantics<arbitrary>], iteration_bounds = array<i64: 2, 2, 1>, scalar_prefetch = 0 : i64, scratch_operands = 0 : i64, tpu.core_type = #tpu.core_type<tc>, window_params = [{transform_indices = @transform_0, window_bounds = array<i64: 1, 4, 256>}, {transform_indices = @transform_1, window_bounds = array<i64: 1, 1, 256>}, {transform_indices = @transform_2, window_bounds = array<i64: 1, 1, 4, 128>}, {transform_indices = @transform_3, window_bounds = array<i64: 1, 1, 4, 128>}]} {
    %c0_i32 = arith.constant 0 : i32
    %0 = arith.cmpi eq, %arg2, %c0_i32 : i32
    %1 = arith.extui %0 : i1 to i32
    %c0_i32_0 = arith.constant 0 : i32
    %2 = arith.cmpi ne, %1, %c0_i32_0 : i32
    scf.if %2 {
      %cst = arith.constant 0.000000e+00 : f32
      %13 = vector.broadcast %cst : f32 to vector<1x1x4x128xf32>
      %c0 = arith.constant 0 : index
      %c0_4 = arith.constant 0 : index
      %c0_5 = arith.constant 0 : index
      %c0_6 = arith.constant 0 : index
      %14 = vector.load %arg5[%c0, %c0_4, %c0_5, %c0_6] : memref<1x1x4x128xf32, #tpu.memory_space<vmem>>, vector<1x1x4x128xf32>
      tpu.vector_store %arg5[%c0, %c0_4, %c0_5, %c0_6], %13 {strides = array<i32>} : memref<1x1x4x128xf32, #tpu.memory_space<vmem>>, vector<1x1x4x128xf32>,
      %cst_7 = arith.constant 0.000000e+00 : f32
      %15 = vector.broadcast %cst_7 : f32 to vector<1x1x4x128xf32>
      %c0_8 = arith.constant 0 : index
      %c0_9 = arith.constant 0 : index
      %c0_10 = arith.constant 0 : index
      %c0_11 = arith.constant 0 : index
      %16 = vector.load %arg6[%c0_8, %c0_9, %c0_10, %c0_11] : memref<1x1x4x128xf32, #tpu.memory_space<vmem>>, vector<1x1x4x128xf32>
      tpu.vector_store %arg6[%c0_8, %c0_9, %c0_10, %c0_11], %15 {strides = array<i32>} : memref<1x1x4x128xf32, #tpu.memory_space<vmem>>, vector<1x1x4x128xf32>,
    } else {
    }
    %c1_i32 = arith.constant 1 : i32
    %3 = arith.muli %arg0, %c1_i32 : i32
    %4 = arith.addi %3, %arg2 : i32
    %5 = tpu.iota {dimensions = array<i32: 0>} : vector<4x1xi32>
    %6 = tpu.iota {dimensions = array<i32: 1>} : vector<1x256xi32>
    %c0_i32_1 = arith.constant 0 : i32
    %7 = arith.cmpi sge, %4, %c0_i32_1 : i32
    %8 = arith.extui %7 : i1 to i32
    %c0_i32_2 = arith.constant 0 : i32
    %9 = arith.cmpi ne, %8, %c0_i32_2 : i32
    scf.if %9 {
      %cst = arith.constant 0.000000e+00 : f32
      %13 = vector.broadcast %cst : f32 to vector<4x128xf32>
      %c0_i32_4 = arith.constant 0 : i32
      %c256_i32 = arith.constant 256 : i32
      %14 = arith.muli %c0_i32_4, %c256_i32 : i32
      %15 = tpu.assume_multiple %14, 256 : i32
      %c0 = arith.constant 0 : index
      %c0_5 = arith.constant 0 : index
      %16 = arith.index_cast %15 : i32 to index
      %17 = vector.load %arg3[%c0, %c0_5, %16] : memref<1x4x256xf32, #tpu.memory_space<vmem>>, vector<1x4x256xf32>
      %18 = vector.shape_cast %17 : vector<1x4x256xf32> to vector<4x256xf32>
      %c0_6 = arith.constant 0 : index
      %c0_7 = arith.constant 0 : index
      %19 = arith.index_cast %15 : i32 to index
      %20 = vector.load %arg4[%c0_6, %c0_7, %19] : memref<1x1x256xi32, #tpu.memory_space<vmem>>, vector<1x1x256xi32>
      %21 = vector.shape_cast %20 : vector<1x1x256xi32> to vector<1x256xi32>
      %cst_8 = arith.constant dense<0xFF800000> : vector<256xf32>
      %22 = vector.multi_reduction <maximumf>, %18, %cst_8 [0] : vector<4x256xf32> to vector<256xf32>
      %23 = vector.shape_cast %22 : vector<256xf32> to vector<1x256xf32>
      %24 = vector.broadcast %23 : vector<1x256xf32> to vector<4x256xf32>
      %25 = arith.subf %18, %24 : vector<4x256xf32>
      %26 = math.exp %25 : vector<4x256xf32>
      %cst_9 = arith.constant dense<0.000000e+00> : vector<256xf32>
      %27 = vector.multi_reduction <add>, %26, %cst_9 [0] : vector<4x256xf32> to vector<256xf32>
      %28 = vector.shape_cast %27 : vector<256xf32> to vector<1x256xf32>
      %29 = tpu.reciprocal %28 : vector<1x256xf32> -> vector<1x256xf32>
      %30 = vector.broadcast %29 : vector<1x256xf32> to vector<4x256xf32>
      %31 = arith.mulf %26, %30 : vector<4x256xf32>
      %32 = vector.broadcast %21 : vector<1x256xi32> to vector<4x256xi32>
      %33 = vector.broadcast %5 : vector<4x1xi32> to vector<4x256xi32>
      %34 = arith.cmpi eq, %32, %33 : vector<4x256xi32>
      %cst_10 = arith.constant 0.000000e+00 : f32
      %35 = vector.broadcast %cst_10 : f32 to vector<4x256xf32>
      %36 = arith.select %34, %31, %35 : vector<4x256xi1>, vector<4x256xf32>
      %c256_i32_11 = arith.constant 256 : i32
      %37 = arith.muli %4, %c256_i32_11 : i32
      %38 = arith.addi %37, %15 : i32
      %39 = vector.broadcast %38 : i32 to vector<1x256xi32>
      %40 = arith.addi %39, %6 : vector<1x256xi32>
      %c256_i32_12 = arith.constant 256 : i32
      %41 = vector.broadcast %c256_i32_12 : i32 to vector<1x256xi32>
      %42 = arith.cmpi slt, %40, %41 : vector<1x256xi32>
      %cst_13 = arith.constant 0.000000e+00 : f32
      %43 = vector.shape_cast %42 : vector<1x256xi1> to vector<1x256xi1>
      %44 = vector.broadcast %43 : vector<1x256xi1> to vector<4x256xi1>
      %45 = vector.broadcast %cst_13 : f32 to vector<4x256xf32>
      %46 = arith.select %44, %36, %45 : vector<4x256xi1>, vector<4x256xf32>
      %cst_14 = arith.constant 0.000000e+00 : f32
      %47 = vector.shape_cast %42 : vector<1x256xi1> to vector<1x256xi1>
      %48 = vector.broadcast %47 : vector<1x256xi1> to vector<4x256xi1>
      %49 = vector.broadcast %cst_14 : f32 to vector<4x256xf32>
      %50 = arith.select %48, %31, %49 : vector<4x256xi1>, vector<4x256xf32>
      %51 = vector.extract_strided_slice %46 {offsets = [0, 0], sizes = [4, 128], strides = [1, 1]} : vector<4x256xf32> to vector<4x128xf32>
      %52 = vector.extract_strided_slice %46 {offsets = [0, 128], sizes = [4, 128], strides = [1, 1]} : vector<4x256xf32> to vector<4x128xf32>
      %53 = arith.addf %51, %52 : vector<4x128xf32>
      %54 = arith.addf %13, %53 : vector<4x128xf32>
      %55 = vector.extract_strided_slice %50 {offsets = [0, 0], sizes = [4, 128], strides = [1, 1]} : vector<4x256xf32> to vector<4x128xf32>
      %56 = vector.extract_strided_slice %50 {offsets = [0, 128], sizes = [4, 128], strides = [1, 1]} : vector<4x256xf32> to vector<4x128xf32>
      %57 = arith.addf %55, %56 : vector<4x128xf32>
      %58 = arith.addf %13, %57 : vector<4x128xf32>
      %c1_i32_15 = arith.constant 1 : i32
      %c0_16 = arith.constant 0 : index
      %c0_17 = arith.constant 0 : index
      %c0_18 = arith.constant 0 : index
      %c0_19 = arith.constant 0 : index
      %59 = vector.load %arg5[%c0_16, %c0_17, %c0_18, %c0_19] : memref<1x1x4x128xf32, #tpu.memory_space<vmem>>, vector<1x1x4x128xf32>
      %60 = vector.shape_cast %54 : vector<4x128xf32> to vector<1x1x4x128xf32>
      %61 = arith.addf %59, %60 : vector<1x1x4x128xf32>
      %c0_20 = arith.constant 0 : index
      %c0_21 = arith.constant 0 : index
      %c0_22 = arith.constant 0 : index
      %c0_23 = arith.constant 0 : index
      %62 = vector.load %arg5[%c0_20, %c0_21, %c0_22, %c0_23] : memref<1x1x4x128xf32, #tpu.memory_space<vmem>>, vector<1x1x4x128xf32>
      tpu.vector_store %arg5[%c0_20, %c0_21, %c0_22, %c0_23], %61 {strides = array<i32>} : memref<1x1x4x128xf32, #tpu.memory_space<vmem>>, vector<1x1x4x128xf32>,
      %c0_24 = arith.constant 0 : index
      %c0_25 = arith.constant 0 : index
      %c0_26 = arith.constant 0 : index
      %c0_27 = arith.constant 0 : index
      %63 = vector.load %arg6[%c0_24, %c0_25, %c0_26, %c0_27] : memref<1x1x4x128xf32, #tpu.memory_space<vmem>>, vector<1x1x4x128xf32>
      %64 = vector.shape_cast %58 : vector<4x128xf32> to vector<1x1x4x128xf32>
      %65 = arith.addf %63, %64 : vector<1x1x4x128xf32>
      %c0_28 = arith.constant 0 : index
      %c0_29 = arith.constant 0 : index
      %c0_30 = arith.constant 0 : index
      %c0_31 = arith.constant 0 : index
      %66 = vector.load %arg6[%c0_28, %c0_29, %c0_30, %c0_31] : memref<1x1x4x128xf32, #tpu.memory_space<vmem>>, vector<1x1x4x128xf32>
      tpu.vector_store %arg6[%c0_28, %c0_29, %c0_30, %c0_31], %65 {strides = array<i32>} : memref<1x1x4x128xf32, #tpu.memory_space<vmem>>, vector<1x1x4x128xf32>,
    } else {
    }
    %true = arith.constant true
    %10 = arith.xori %7, %true : i1
    %11 = arith.extui %10 : i1 to i32
    %c0_i32_3 = arith.constant 0 : i32
    %12 = arith.cmpi ne, %11, %c0_i32_3 : i32
    scf.if %12 {
      %cst = arith.constant 0.000000e+00 : f32
      %13 = vector.broadcast %cst : f32 to vector<4x128xf32>
      %c0_i32_4 = arith.constant 0 : i32
      %c256_i32 = arith.constant 256 : i32
      %14 = arith.muli %c0_i32_4, %c256_i32 : i32
      %15 = tpu.assume_multiple %14, 256 : i32
      %c0 = arith.constant 0 : index
      %c0_5 = arith.constant 0 : index
      %16 = arith.index_cast %15 : i32 to index
      %17 = vector.load %arg3[%c0, %c0_5, %16] : memref<1x4x256xf32, #tpu.memory_space<vmem>>, vector<1x4x256xf32>
      %18 = vector.shape_cast %17 : vector<1x4x256xf32> to vector<4x256xf32>
      %c0_6 = arith.constant 0 : index
      %c0_7 = arith.constant 0 : index
      %19 = arith.index_cast %15 : i32 to index
      %20 = vector.load %arg4[%c0_6, %c0_7, %19] : memref<1x1x256xi32, #tpu.memory_space<vmem>>, vector<1x1x256xi32>
      %21 = vector.shape_cast %20 : vector<1x1x256xi32> to vector<1x256xi32>
      %cst_8 = arith.constant dense<0xFF800000> : vector<256xf32>
      %22 = vector.multi_reduction <maximumf>, %18, %cst_8 [0] : vector<4x256xf32> to vector<256xf32>
      %23 = vector.shape_cast %22 : vector<256xf32> to vector<1x256xf32>
      %24 = vector.broadcast %23 : vector<1x256xf32> to vector<4x256xf32>
      %25 = arith.subf %18, %24 : vector<4x256xf32>
      %26 = math.exp %25 : vector<4x256xf32>
      %cst_9 = arith.constant dense<0.000000e+00> : vector<256xf32>
      %27 = vector.multi_reduction <add>, %26, %cst_9 [0] : vector<4x256xf32> to vector<256xf32>
      %28 = vector.shape_cast %27 : vector<256xf32> to vector<1x256xf32>
      %29 = tpu.reciprocal %28 : vector<1x256xf32> -> vector<1x256xf32>
      %30 = vector.broadcast %29 : vector<1x256xf32> to vector<4x256xf32>
      %31 = arith.mulf %26, %30 : vector<4x256xf32>
      %32 = vector.broadcast %21 : vector<1x256xi32> to vector<4x256xi32>
      %33 = vector.broadcast %5 : vector<4x1xi32> to vector<4x256xi32>
      %34 = arith.cmpi eq, %32, %33 : vector<4x256xi32>
      %cst_10 = arith.constant 0.000000e+00 : f32
      %35 = vector.broadcast %cst_10 : f32 to vector<4x256xf32>
      %36 = arith.select %34, %31, %35 : vector<4x256xi1>, vector<4x256xf32>
      %37 = vector.extract_strided_slice %36 {offsets = [0, 0], sizes = [4, 128], strides = [1, 1]} : vector<4x256xf32> to vector<4x128xf32>
      %38 = vector.extract_strided_slice %36 {offsets = [0, 128], sizes = [4, 128], strides = [1, 1]} : vector<4x256xf32> to vector<4x128xf32>
      %39 = arith.addf %37, %38 : vector<4x128xf32>
      %40 = arith.addf %13, %39 : vector<4x128xf32>
      %41 = vector.extract_strided_slice %31 {offsets = [0, 0], sizes = [4, 128], strides = [1, 1]} : vector<4x256xf32> to vector<4x128xf32>
      %42 = vector.extract_strided_slice %31 {offsets = [0, 128], sizes = [4, 128], strides = [1, 1]} : vector<4x256xf32> to vector<4x128xf32>
      %43 = arith.addf %41, %42 : vector<4x128xf32>
      %44 = arith.addf %13, %43 : vector<4x128xf32>
      %c1_i32_11 = arith.constant 1 : i32
      %c0_12 = arith.constant 0 : index
      %c0_13 = arith.constant 0 : index
      %c0_14 = arith.constant 0 : index
      %c0_15 = arith.constant 0 : index
      %45 = vector.load %arg5[%c0_12, %c0_13, %c0_14, %c0_15] : memref<1x1x4x128xf32, #tpu.memory_space<vmem>>, vector<1x1x4x128xf32>
      %46 = vector.shape_cast %40 : vector<4x128xf32> to vector<1x1x4x128xf32>
      %47 = arith.addf %45, %46 : vector<1x1x4x128xf32>
      %c0_16 = arith.constant 0 : index
      %c0_17 = arith.constant 0 : index
      %c0_18 = arith.constant 0 : index
      %c0_19 = arith.constant 0 : index
      %48 = vector.load %arg5[%c0_16, %c0_17, %c0_18, %c0_19] : memref<1x1x4x128xf32, #tpu.memory_space<vmem>>, vector<1x1x4x128xf32>
      tpu.vector_store %arg5[%c0_16, %c0_17, %c0_18, %c0_19], %47 {strides = array<i32>} : memref<1x1x4x128xf32, #tpu.memory_space<vmem>>, vector<1x1x4x128xf32>,
      %c0_20 = arith.constant 0 : index
      %c0_21 = arith.constant 0 : index
      %c0_22 = arith.constant 0 : index
      %c0_23 = arith.constant 0 : index
      %49 = vector.load %arg6[%c0_20, %c0_21, %c0_22, %c0_23] : memref<1x1x4x128xf32, #tpu.memory_space<vmem>>, vector<1x1x4x128xf32>
      %50 = vector.shape_cast %44 : vector<4x128xf32> to vector<1x1x4x128xf32>
      %51 = arith.addf %49, %50 : vector<1x1x4x128xf32>
      %c0_24 = arith.constant 0 : index
      %c0_25 = arith.constant 0 : index
      %c0_26 = arith.constant 0 : index
      %c0_27 = arith.constant 0 : index
      %52 = vector.load %arg6[%c0_24, %c0_25, %c0_26, %c0_27] : memref<1x1x4x128xf32, #tpu.memory_space<vmem>>, vector<1x1x4x128xf32>
      tpu.vector_store %arg6[%c0_24, %c0_25, %c0_26, %c0_27], %51 {strides = array<i32>} : memref<1x1x4x128xf32, #tpu.memory_space<vmem>>, vector<1x1x4x128xf32>,
    } else {
    }
    return
  }
  func.func @transform_0(%arg0: i32, %arg1: i32, %arg2: i32) -> (i32, i32, i32) {
    %c1_i32 = arith.constant 1 : i32
    %0 = arith.muli %arg0, %c1_i32 : i32
    %1 = arith.addi %0, %arg2 : i32
    %c0_i32 = arith.constant 0 : i32
    %2 = arith.minsi %1, %c0_i32 : i32
    %c0_i32_0 = arith.constant 0 : i32
    %c0_i32_1 = arith.constant 0 : i32
    return %arg1, %c0_i32_0, %2 : i32, i32, i32
  }
  func.func @transform_1(%arg0: i32, %arg1: i32, %arg2: i32) -> (i32, i32, i32) {
    %c1_i32 = arith.constant 1 : i32
    %0 = arith.muli %arg0, %c1_i32 : i32
    %1 = arith.addi %0, %arg2 : i32
    %c0_i32 = arith.constant 0 : i32
    %2 = arith.minsi %1, %c0_i32 : i32
    %c0_i32_0 = arith.constant 0 : i32
    %c0_i32_1 = arith.constant 0 : i32
    return %arg1, %c0_i32_0, %2 : i32, i32, i32
  }
  func.func @transform_2(%arg0: i32, %arg1: i32, %arg2: i32) -> (i32, i32, i32, i32) {
    %c0_i32 = arith.constant 0 : i32
    %c0_i32_0 = arith.constant 0 : i32
    %c0_i32_1 = arith.constant 0 : i32
    return %arg0, %arg1, %c0_i32, %c0_i32_0 : i32, i32, i32, i32
  }
  func.func @transform_3(%arg0: i32, %arg1: i32, %arg2: i32) -> (i32, i32, i32, i32) {
    %c0_i32 = arith.constant 0 : i32
    %c0_i32_0 = arith.constant 0 : i32
    %c0_i32_1 = arith.constant 0 : i32
    return %arg0, %arg1, %c0_i32, %c0_i32_0 : i32, i32, i32, i32
  }
}

</mosaic_0001>

<bundles_post_ra>
// kernel: soft_iou_loss.1
= control target key start
LH: loop header
LB: loop body
LE: loop exit
PB: predicated region body
PF: predicated region fallthrough
CT: control target
= control target key end

     0   :  { %s785_s12 = smov 0   ;;  %s787_s13 = smov 0   ;;  %s901_s0 = inlined_call_operand.vmem [shape: f32[2,4,256], index: 0, kind: input, shape index: {}]   ;;  %s902_s1 = inlined_call_operand.vmem [shape: s32[2,1,256], index: 1, kind: input, shape index: {}]   ;;  %s903_s2 = inlined_call_operand.vmem [shape: f32[2,2,4,128], index: 2, kind: output, shape index: {0}]   ;;  %s904_s3 = inlined_call_operand.vmem [shape: f32[2,2,4,128], index: 3, kind: output, shape index: {1}]  }
   0x1   :  { %s789_s14 = smov 0   ;;  %s791_s15 = smov 0  }
   0x2   :  { %s793_s16 = smov 0  }
   0x3 LB: > { %s29_s17 = sadd.s32 1, %s754_s14  ;;  %s33_s18 = sadd.s32 1, %s758_s15  ;;  %s762_s16 = sphi %s793_s16, %s14_s16   ;;  %s758_s15 = sphi %s791_s15, %s908_s15   ;;  %s754_s14 = sphi %s789_s14, %s907_s14   ;;  %s750_s13 = sphi %s787_s13, %s906_s13   ;;  %s746_s12 = sphi %s785_s12, %s905_s12  }
   0x4   : > { %p31_p0 = scmp.ge.s32.totalorder %s29_s17, 2  ;;  %p654_p1 = scmp.ge.s32.totalorder %s762_s16, 1 }
   0x5   : > { %p210_p2 = scmp.lt.s32.totalorder %s762_s16, 5 }
   0x6   : > { %s910_s17 = smov (%p31_p0, %s29_s17), 0  ;;  %s912_s18 = smov (!%p31_p0, %s33_s18), %s758_s15 }
   0x7   : > { %p211_p3 = pnand %p654_p1, %p210_p2  ;;  %p35_p4 = scmp.ge.s32.totalorder %s912_s18, 2 }
   0x8   : > { %p264_p5 = scmp.lt.s32.totalorder (!%p211_p3), %s750_s13, 0  ;;  %p267_p6 = scmp.lt.s32.totalorder (!%p211_p3), %s746_s12, 1  ;;  %v317_v0 = vlaneseq (!%p211_p3)  ;;  %v764_v4 = vmov (!%p211_p3), 0.0  }
   0x9   : > { %s914_s18 = smov (%p35_p4, %s912_s18), 0  ;;  %214 = sbr.rel (%p211_p3) target bundleno = 169 (0xa9), region = 28 }
   0xa   : > { %p294_p7 = scmp.lt.s32.totalorder (!%p211_p3), %s750_s13, 1  ;;  %v822_v1 = vshrl.u32 (!%p211_p3), %v317_v0, 7  ;;  %v824_v2 = vand.u32 (!%p211_p3), 127, %v317_v0 }
   0xc   : > { %v827_v3 = vadd.s32 (!%p211_p3), 128, %v824_v2 }
  0x10   : > { %s265_s19 = scalar_select %p264_p5, %s750_s13, 0  ;;  %vm331_vm0 = vcmask (!%p264_p5), 1043456   ;;  %v379_v40 = vsub.s32 (!%p264_p5), 0, %v822_v1  ;;  %v383_v43 = vsub.s32 (!%p264_p5), 1, %v822_v1 }
  0x11   : > { %s916_s12 = smov (!%p267_p6, %s746_s12), 1 }
  0x12   : > { %s655_s20 = sshll.u32 %s265_s19, 1  ;;  %s656_s21 = sshll.u32 %s916_s12, 1 }
  0x13   : > { %p269_p8 = scmp.lt.s32.totalorder %s655_s20, 1  ;;  %s665_s19 = sshll.u32 (!%p264_p5), %s750_s13, 8 }
  0x14   : > { %s295_s22 = scalar_select %p294_p7, %s750_s13, 1 }
  0x15   : > { %s918_s20 = smov (!%p269_p8, %s655_s20), 1  ;;  %325 = sbr.rel (%p264_p5) target bundleno = 97 (0x61), region = 36 }
  0x16   : > { %s660_s23 = sshll.u32 %s295_s22, 1  ;;  %s272_s24 = sadd.s32 %s656_s21, %s918_s20  ;;  %v394_v42 = vstv (!%p264_p5), %s665_s19 }
  0x17   : > { %s299_s25 = sadd.s32 %s660_s23, %s916_s12  ;;  %s657_s26 = sshll.u32 %s272_s24, 2  ;;  %v395_v46 = vadd.s32 (!%p264_p5), %v394_v42, %v824_v2  ;;  %v396_v49 = vadd.s32 (!%p264_p5), %v394_v42, %v827_v3 }
  0x18   : > { %s833_s29 = scalar_lea.vmem %s902_s1, %s272_s24  ;;  %s838_s5 = scalar_lea.vmem %s901_s0, %s657_s26 }
  0x19   : > { %s661_s6 = sshll.u32 %s299_s25, 2  ;;  %v326_v5 = vld [vmem:[%s838_s5] sm:$0xff] (!%p264_p5)  ;;  %vm397_vm2 = vcmp.lt.s32.totalorder (!%p264_p5), %v395_v46, 256  ;;  %vm398_vm4 = vcmp.lt.s32.totalorder (!%p264_p5), %v396_v49, 256 }
  0x1a   : > { %s843_s9 = scalar_lea.vmem %s903_s2, %s661_s6  ;;  %s848_s12 = scalar_lea.vmem %s904_s3, %s661_s6  ;;  %v329_v6 = vcombine.high (!%p264_p5), %v326_v5, %v326_v5  ;;  %v332_v7 = vsel (!%p264_p5), %vm331_vm0, %v326_v5, -inf  ;;  %v327_v41 = vld [vmem:[%s833_s29] sm:$0x3] (!%p264_p5) }
  0x1b   : > { %314 = vst [vmem:[%s843_s9] sm:$0xf] %v764_v4  ;;  %315 = vst [vmem:[%s848_s12] sm:$0xf] %v764_v4  ;;  %v333_v8 = vrot.slane (!%p264_p5), %v332_v7, 4  ;;  %v380_v45 = vrot.slane (!%p264_p5), %v327_v41, %v379_v40  ;;  %v384_v48 = vrot.slane (!%p264_p5), %v327_v41, %v383_v43 }
  0x1c   : > { %v339_v9 = vsel %vm331_vm0, %v329_v6, -inf }
  0x1d   : > { %v334_v10 = vmax.f32 %v332_v7, %v333_v8  ;;  %v340_v11 = vrot.slane %v339_v9, 4  ;;  %vm385_vm1 = vcmp.eq.s32.totalorder %v380_v45, %v822_v1  ;;  %vm386_vm3 = vcmp.eq.s32.totalorder %v384_v48, %v822_v1 }
  0x1f   : > { %v335_v12 = vrot.slane %v334_v10, 2  ;;  %v341_v13 = vmax.f32 %v339_v9, %v340_v11 }
  0x21   : > { %v336_v14 = vmax.f32 %v334_v10, %v335_v12  ;;  %v342_v15 = vrot.slane %v341_v13, 2 }
  0x22   : > { %v414_v58 = vld [vmem:[%s848_s12] sm:$0xf] }
  0x23   : > { %v337_v16 = vrot.slane %v336_v14, 1  ;;  %v343_v17 = vmax.f32 %v341_v13, %v342_v15  ;;  %v411_v60 = vld [vmem:[%s843_s9] sm:$0xf] }
  0x25   : > { %v338_v18 = vmax.f32 %v336_v14, %v337_v16  ;;  %v344_v19 = vrot.slane %v343_v17, 1 }
  0x27   : > { %v345_v20 = vmax.f32 %v343_v17, %v344_v19 }
  0x29   : > { %v348_v21 = vcombine.low %v338_v18, %v345_v20 }
  0x2b   : > { %v350_v22 = vsub.f32 %v326_v5, %v348_v21 }
  0x2d   : > { %v351_v23 = vmul.f32 1.442695, %v350_v22 }
  0x2f   : > { %711 = vpow2.f32 %v351_v23 }
  0x39   : > { %v712_v24 = vpop.eup %711 }
  0x3a   : > { %v354_v25 = vcombine.high %v712_v24, %v712_v24  ;;  %v356_v26 = vsel %vm331_vm0, %v712_v24, 0.0 }
  0x3b   : > { %v357_v27 = vrot.slane %v356_v26, 4 }
  0x3c   : > { %v363_v28 = vsel %vm331_vm0, %v354_v25, 0.0 }
  0x3d   : > { %v358_v29 = vadd.f32 %v357_v27, %v356_v26  ;;  %v364_v30 = vrot.slane %v363_v28, 4 }
  0x3f   : > { %v359_v31 = vrot.slane %v358_v29, 2  ;;  %v365_v32 = vadd.f32 %v364_v30, %v363_v28 }
  0x41   : > { %v360_v33 = vadd.f32 %v359_v31, %v358_v29  ;;  %v366_v34 = vrot.slane %v365_v32, 2 }
  0x43   : > { %v361_v35 = vrot.slane %v360_v33, 1  ;;  %v367_v36 = vadd.f32 %v366_v34, %v365_v32 }
  0x45   : > { %v362_v37 = vadd.f32 %v361_v35, %v360_v33  ;;  %v368_v38 = vrot.slane %v367_v36, 1 }
  0x47   : > { %v369_v39 = vadd.f32 %v368_v38, %v367_v36  ;;  %713 = vrcp.f32 %v362_v37 }
  0x49   : > { %715 = vrcp.f32 %v369_v39 }
  0x51   : > { %v714_v44 = vpop.eup %713 }
  0x53   : > { %v716_v47 = vpop.eup %715 }
  0x54   : > { %v374_v50 = vcombine.low %v714_v44, %v716_v47 }
  0x56   : > { %v376_v51 = vmul.f32 %v712_v24, %v374_v50 }
  0x58   : > { %v388_v52 = vcombine.high %v376_v51, %v376_v51  ;;  %v390_v53 = vsel %vm385_vm1, %v376_v51, 0.0  ;;  %v405_v54 = vsel %vm397_vm2, %v376_v51, 0.0 }
  0x59   : > { %v403_v55 = vsel %vm397_vm2, %v390_v53, 0.0 }
  0x5a   : > { %v391_v56 = vsel %vm386_vm3, %v388_v52, 0.0  ;;  %v406_v57 = vsel %vm398_vm4, %v388_v52, 0.0 }
  0x5b   : > { %v404_v59 = vsel %vm398_vm4, %v391_v56, 0.0  ;;  %v409_v61 = vadd.f32 %v406_v57, %v405_v54 }
  0x5c   : > { %v407_v62 = vadd.f32 %v404_v59, %v403_v55 }
  0x5d   : > { %v415_v63 = vadd.f32 %v414_v58, %v409_v61 }
  0x5e   : > { %v412_v0 = vadd.f32 %v411_v60, %v407_v62 }
  0x5f   : > { %416 = vst [vmem:[%s848_s12] sm:$0xf] %v415_v63 }
  0x60   : > { %413 = vst [vmem:[%s843_s9] sm:$0xf] %v412_v0 }
  0x61 PF: > { %p666_p9 = scmp.ge.s32.totalorder %s750_s13, 0 }
  0x62   : > { %v421_v2 = vld [vmem:[%s838_s5] sm:$0xff] (!%p666_p9)  ;;  %vm426_vm5 = vcmask (!%p666_p9), 1043456   ;;  %v474_v37 = vsub.s32 (!%p666_p9), 0, %v822_v1  ;;  %v478_v39 = vsub.s32 (!%p666_p9), 1, %v822_v1 }
  0x63   : > { %420 = sbr.rel (%p666_p9) target bundleno = 169 (0xa9), region = 40  ;;  %v424_v3 = vcombine.high (!%p666_p9), %v421_v2, %v421_v2  ;;  %v427_v4 = vsel (!%p666_p9), %vm426_vm5, %v421_v2, -inf  ;;  %v422_v38 = vld [vmem:[%s833_s29] sm:$0x3] (!%p666_p9) }
  0x64   : > { %v428_v5 = vrot.slane (!%p666_p9), %v427_v4, 4  ;;  %v475_v41 = vrot.slane (!%p666_p9), %v422_v38, %v474_v37  ;;  %v479_v43 = vrot.slane (!%p666_p9), %v422_v38, %v478_v39 }
  0x65   : > { %v434_v6 = vsel (!%p666_p9), %vm426_vm5, %v424_v3, -inf }
  0x66   : > { %v429_v7 = vmax.f32 (!%p666_p9), %v427_v4, %v428_v5  ;;  %v435_v8 = vrot.slane (!%p666_p9), %v434_v6, 4  ;;  %vm480_vm6 = vcmp.eq.s32.totalorder (!%p666_p9), %v475_v41, %v822_v1  ;;  %vm481_vm7 = vcmp.eq.s32.totalorder (!%p666_p9), %v479_v43, %v822_v1 }
  0x67   : > { %v496_v49 = vld [vmem:[%s848_s12] sm:$0xf] (!%p666_p9) }
  0x68   : > { %v430_v9 = vrot.slane (!%p666_p9), %v429_v7, 2  ;;  %v436_v10 = vmax.f32 (!%p666_p9), %v434_v6, %v435_v8  ;;  %v493_v51 = vld [vmem:[%s843_s9] sm:$0xf] (!%p666_p9) }
  0x6a   : > { %v431_v11 = vmax.f32 %v429_v7, %v430_v9  ;;  %v437_v12 = vrot.slane %v436_v10, 2 }
  0x6c   : > { %v432_v13 = vrot.slane %v431_v11, 1  ;;  %v438_v14 = vmax.f32 %v436_v10, %v437_v12 }
  0x6e   : > { %v433_v15 = vmax.f32 %v431_v11, %v432_v13  ;;  %v439_v16 = vrot.slane %v438_v14, 1 }
  0x70   : > { %v440_v17 = vmax.f32 %v438_v14, %v439_v16 }
  0x72   : > { %v443_v18 = vcombine.low %v433_v15, %v440_v17 }
  0x74   : > { %v445_v19 = vsub.f32 %v421_v2, %v443_v18 }
  0x76   : > { %v446_v20 = vmul.f32 1.442695, %v445_v19 }
  0x78   : > { %718 = vpow2.f32 %v446_v20 }
  0x82   : > { %v719_v21 = vpop.eup %718 }
  0x83   : > { %v449_v22 = vcombine.high %v719_v21, %v719_v21  ;;  %v451_v23 = vsel %vm426_vm5, %v719_v21, 0.0 }
  0x84   : > { %v452_v24 = vrot.slane %v451_v23, 4 }
  0x85   : > { %v458_v25 = vsel %vm426_vm5, %v449_v22, 0.0 }
  0x86   : > { %v453_v26 = vadd.f32 %v452_v24, %v451_v23  ;;  %v459_v27 = vrot.slane %v458_v25, 4 }
  0x88   : > { %v454_v28 = vrot.slane %v453_v26, 2  ;;  %v460_v29 = vadd.f32 %v459_v27, %v458_v25 }
  0x8a   : > { %v455_v30 = vadd.f32 %v454_v28, %v453_v26  ;;  %v461_v31 = vrot.slane %v460_v29, 2 }
  0x8c   : > { %v456_v32 = vrot.slane %v455_v30, 1  ;;  %v462_v33 = vadd.f32 %v461_v31, %v460_v29 }
  0x8e   : > { %v457_v34 = vadd.f32 %v456_v32, %v455_v30  ;;  %v463_v35 = vrot.slane %v462_v33, 1 }
  0x90   : > { %v464_v36 = vadd.f32 %v463_v35, %v462_v33  ;;  %720 = vrcp.f32 %v457_v34 }
  0x92   : > { %722 = vrcp.f32 %v464_v36 }
  0x9a   : > { %v721_v40 = vpop.eup %720 }
  0x9c   : > { %v723_v42 = vpop.eup %722 }
  0x9d   : > { %v469_v44 = vcombine.low %v721_v40, %v723_v42 }
  0x9f   : > { %v471_v45 = vmul.f32 %v719_v21, %v469_v44 }
  0xa1   : > { %v483_v46 = vcombine.high %v471_v45, %v471_v45  ;;  %v485_v47 = vsel %vm480_vm6, %v471_v45, 0.0  ;;  %v489_v48 = vrot.slane %v471_v45, 4 }
  0xa3   : > { %v486_v50 = vsel %vm481_vm7, %v483_v46, 0.0  ;;  %v491_v52 = vadd.f32 %v489_v48, %v471_v45 }
  0xa4   : > { %v487_v53 = vadd.f32 %v486_v50, %v485_v47 }
  0xa5   : > { %v497_v54 = vadd.f32 %v496_v49, %v491_v52 }
  0xa6   : > { %v494_v55 = vadd.f32 %v493_v51, %v487_v53 }
  0xa7   : > { %498 = vst [vmem:[%s848_s12] sm:$0xf] %v497_v54 }
  0xa8   : > { %495 = vst [vmem:[%s843_s9] sm:$0xf] %v494_v55 }
  0xa9 PF: > { %s14_s16 = sadd.s32 1, %s762_s16   ;;  %s905_s12 = smov %s754_s14 }
  0xaa   : > { %p11_p10 = scmp.ge.s32.totalorder %s14_s16, 6   ;;  %s906_s13 = smov %s758_s15 }
  0xab   : > { %s907_s14 = smov %s910_s17  ;;  %s908_s15 = smov %s914_s18 }
  0xac   :  { %13 = sbr.rel (!%p11_p10) target bundleno = 3 (0x3), region = 85 }

</bundles_post_ra>
